<compile_context>
chip_gen: v5e
topology: v5e:2x2
jax: 0.10.0
libtpu: 0.0.40
codegen_flags: <defaults>
</compile_context>

<pallas_src>
import functools

import jax
import jax.numpy as jnp
from jax.experimental import pallas as pl
from jax.experimental.pallas import tpu as pltpu

_LANE = 128   # lane width: output columns padded to a multiple of this
_SUBLANE = 8  # sublane width: batch rows padded to a multiple of this
_MAX_TB = 512 # batch-tile cap (keeps double-buffered tiles tiny vs. VMEM)


def _round_up(n, m):
    return ((n + m - 1) // m) * m


def _mlp_kernel(x_ref, w1_ref, b1_ref, w2_ref, b2_ref, o_ref):
    # x: [TB, D_in], w1: [D_in, H], b1: [1, H],
    # w2: [H, N_pad], b2: [1, N_pad], o: [TB, N_pad]  (N_pad % 128 == 0)
    h = jnp.dot(x_ref[...], w1_ref[...], preferred_element_type=jnp.float32)
    h = jnp.maximum(h + b1_ref[...], 0.0)            # bias + ReLU (fp32 VALU)
    o = jnp.dot(h, w2_ref[...], preferred_element_type=jnp.float32)
    o = o + b2_ref[...]
    o_ref[...] = o.astype(o_ref.dtype)               # lane-dense unmasked store


@functools.partial(jax.jit, static_argnames=("output_dims",))
def multi_head_classifier(x, w1, b1, w2, b2, output_dims):
    """Pallas MLP forward, then a torch.split(dim=1) equivalent."""
    B, d_in = x.shape
    hidden = w1.shape[1]
    out_total = w2.shape[1]
    assert sum(output_dims) == out_total

    # ---- lane-dense output padding (zeros -> padded columns are exactly 0) ----
    n_pad = _round_up(out_total, _LANE)
    if n_pad != out_total:
        w2p = jnp.zeros((hidden, n_pad), w2.dtype).at[:, :out_total].set(w2)
        b2p = jnp.zeros((1, n_pad), b2.dtype).at[:, :out_total].set(b2)
    else:
        w2p, b2p = w2, b2

    # ---- batch tiling: pad B to a multiple of the tile, grid over row tiles ----
    tb = min(_MAX_TB, _round_up(B, _SUBLANE))
    b_pad = _round_up(B, tb)
    if b_pad != B:
        xp = jnp.zeros((b_pad, d_in), x.dtype).at[:B, :].set(x)
    else:
        xp = x
    grid = (b_pad // tb,)

    out = pl.pallas_call(
        _mlp_kernel,
        out_shape=jax.ShapeDtypeStruct((b_pad, n_pad), jnp.float32),
        grid_spec=pltpu.PrefetchScalarGridSpec(
            num_scalar_prefetch=0,
            grid=grid,
            in_specs=[
                # x: tiled along batch, pipelined against compute.
                pl.BlockSpec((tb, d_in), lambda i: (i, 0)),
                # Weights / biases: constant index_map -> DMA'd once, VMEM-resident.
                pl.BlockSpec((d_in, hidden), lambda i: (0, 0)),
                pl.BlockSpec((1, hidden), lambda i: (0, 0)),
                pl.BlockSpec((hidden, n_pad), lambda i: (0, 0)),
                pl.BlockSpec((1, n_pad), lambda i: (0, 0)),
            ],
            out_specs=pl.BlockSpec((tb, n_pad), lambda i: (i, 0)),
        ),
        compiler_params=pltpu.CompilerParams(
            dimension_semantics=("parallel",),   # shard batch across TCs on v7x
        ),
    )(xp, w1, b1, w2p, b2p)

    # Drop batch / lane padding, then torch.split(x, output_dims, dim=1).
    out = out[:B, :out_total]
    split_points = []
    acc = 0
    for d in output_dims[:-1]:
        acc += d
        split_points.append(acc)
    return tuple(jnp.split(out, split_points, axis=1))


def init_params(key, input_dim, hidden_dim, out_total):
    """Deterministic init mimicking nn.Linear's uniform(-1/sqrt(fan_in), +)."""
    k1, k2, k3, k4 = jax.random.split(key, 4)
    bound1 = 1.0 / (input_dim ** 0.5)
    bound2 = 1.0 / (hidden_dim ** 0.5)
    w1 = jax.random.uniform(k1, (input_dim, hidden_dim), jnp.float32, -bound1, bound1)
    b1 = jax.random.uniform(k2, (1, hidden_dim), jnp.float32, -bound1, bound1)
    w2 = jax.random.uniform(k3, (hidden_dim, out_total), jnp.float32, -bound2, bound2)
    b2 = jax.random.uniform(k4, (1, out_total), jnp.float32, -bound2, bound2)
    return w1, b1, w2, b2


if __name__ == "__main__":
    # Small shapes consistent with the module: batch=8, input_dim=32,
    # hidden=128 (fixed by the module), output_dims=[1, 3].
    batch = 8
    input_dim = 32
    hidden_dim = 128
    output_dims = (1, 3)
    out_total = sum(output_dims)

    key = jax.random.PRNGKey(0)
    kx, kp = jax.random.split(key)
    x = jax.random.normal(kx, (batch, input_dim), jnp.float32)
    w1, b1, w2, b2 = init_params(kp, input_dim, hidden_dim, out_total)

    outs = multi_head_classifier(x, w1, b1, w2, b2, output_dims)
    outs = jax.block_until_ready(outs)

    # Reference check in plain JAX (same math as the PyTorch forward).
    h_ref = jnp.maximum(x @ w1 + b1, 0.0)
    full_ref = h_ref @ w2 + b2
    ref_splits = jnp.split(full_ref, [output_dims[0]], axis=1)
    for got, want, d in zip(outs, ref_splits, output_dims):
        assert got.shape == (batch, d), got.shape
        assert jnp.allclose(got, want, atol=1e-5, rtol=1e-5)

    print("KERNEL_OK")
</pallas_src>

<mosaic_0001>
module attributes {stable_mosaic.version = 11 : i64} {
  func.func @_mlp_kernel(%arg0: i32, %arg1: memref<8x32xf32, #tpu.memory_space<vmem>>, %arg2: memref<32x128xf32, #tpu.memory_space<vmem>>, %arg3: memref<1x128xf32, #tpu.memory_space<vmem>>, %arg4: memref<128x128xf32, #tpu.memory_space<vmem>>, %arg5: memref<1x128xf32, #tpu.memory_space<vmem>>, %arg6: memref<8x128xf32, #tpu.memory_space<vmem>>) attributes {dimension_semantics = [#tpu.dimension_semantics<parallel>], iteration_bounds = array<i64: 1>, scalar_prefetch = 0 : i64, scratch_operands = 0 : i64, tpu.core_type = #tpu.core_type<tc>, window_params = [{transform_indices = @transform_0, window_bounds = array<i64: 8, 32>}, {pipeline_mode = #tpu.pipeline_mode<synchronous>, transform_indices = @transform_1, window_bounds = array<i64: 32, 128>}, {pipeline_mode = #tpu.pipeline_mode<synchronous>, transform_indices = @transform_2, window_bounds = array<i64: 1, 128>}, {pipeline_mode = #tpu.pipeline_mode<synchronous>, transform_indices = @transform_3, window_bounds = array<i64: 128, 128>}, {pipeline_mode = #tpu.pipeline_mode<synchronous>, transform_indices = @transform_4, window_bounds = array<i64: 1, 128>}, {transform_indices = @transform_5, window_bounds = array<i64: 8, 128>}]} {
    %c0 = arith.constant 0 : index
    %c0_0 = arith.constant 0 : index
    %0 = vector.load %arg1[%c0, %c0_0] : memref<8x32xf32, #tpu.memory_space<vmem>>, vector<8x32xf32>
    %c0_1 = arith.constant 0 : index
    %c0_2 = arith.constant 0 : index
    %1 = vector.load %arg2[%c0_1, %c0_2] : memref<32x128xf32, #tpu.memory_space<vmem>>, vector<32x128xf32>
    %cst = arith.constant dense<0.000000e+00> : vector<8x128xf32>
    %2 = tpu.matmul %0, %1, %cst {dimension_numbers = #tpu.dot_dimension_numbers<[1], [0], [0], [1], [0, 0, 1, 1], [], []>} : vector<8x32xf32>, vector<32x128xf32>, vector<8x128xf32> -> vector<8x128xf32>
    %c0_3 = arith.constant 0 : index
    %c0_4 = arith.constant 0 : index
    %3 = vector.load %arg3[%c0_3, %c0_4] : memref<1x128xf32, #tpu.memory_space<vmem>>, vector<1x128xf32>
    %4 = vector.broadcast %3 : vector<1x128xf32> to vector<8x128xf32>
    %5 = arith.addf %2, %4 : vector<8x128xf32>
    %cst_5 = arith.constant 0.000000e+00 : f32
    %6 = vector.broadcast %cst_5 : f32 to vector<8x128xf32>
    %7 = arith.maximumf %5, %6 : vector<8x128xf32>
    %c0_6 = arith.constant 0 : index
    %c0_7 = arith.constant 0 : index
    %8 = vector.load %arg4[%c0_6, %c0_7] : memref<128x128xf32, #tpu.memory_space<vmem>>, vector<128x128xf32>
    %cst_8 = arith.constant dense<0.000000e+00> : vector<8x128xf32>
    %9 = tpu.matmul %7, %8, %cst_8 {dimension_numbers = #tpu.dot_dimension_numbers<[1], [0], [0], [1], [0, 0, 1, 1], [], []>} : vector<8x128xf32>, vector<128x128xf32>, vector<8x128xf32> -> vector<8x128xf32>
    %c0_9 = arith.constant 0 : index
    %c0_10 = arith.constant 0 : index
    %10 = vector.load %arg5[%c0_9, %c0_10] : memref<1x128xf32, #tpu.memory_space<vmem>>, vector<1x128xf32>
    %11 = vector.broadcast %10 : vector<1x128xf32> to vector<8x128xf32>
    %12 = arith.addf %9, %11 : vector<8x128xf32>
    %c0_11 = arith.constant 0 : index
    %c0_12 = arith.constant 0 : index
    %13 = vector.load %arg6[%c0_11, %c0_12] : memref<8x128xf32, #tpu.memory_space<vmem>>, vector<8x128xf32>
    tpu.vector_store %arg6[%c0_11, %c0_12], %12 {strides = array<i32>} : memref<8x128xf32, #tpu.memory_space<vmem>>, vector<8x128xf32>,
    return
  }
  func.func @transform_0(%arg0: i32) -> (i32, i32) {
    %c0_i32 = arith.constant 0 : i32
    %c0_i32_0 = arith.constant 0 : i32
    return %arg0, %c0_i32 : i32, i32
  }
  func.func @transform_1(%arg0: i32) -> (i32, i32) {
    %c0_i32 = arith.constant 0 : i32
    %c0_i32_0 = arith.constant 0 : i32
    %c0_i32_1 = arith.constant 0 : i32
    return %c0_i32, %c0_i32_0 : i32, i32
  }
  func.func @transform_2(%arg0: i32) -> (i32, i32) {
    %c0_i32 = arith.constant 0 : i32
    %c0_i32_0 = arith.constant 0 : i32
    %c0_i32_1 = arith.constant 0 : i32
    return %c0_i32, %c0_i32_0 : i32, i32
  }
  func.func @transform_3(%arg0: i32) -> (i32, i32) {
    %c0_i32 = arith.constant 0 : i32
    %c0_i32_0 = arith.constant 0 : i32
    %c0_i32_1 = arith.constant 0 : i32
    return %c0_i32, %c0_i32_0 : i32, i32
  }
  func.func @transform_4(%arg0: i32) -> (i32, i32) {
    %c0_i32 = arith.constant 0 : i32
    %c0_i32_0 = arith.constant 0 : i32
    %c0_i32_1 = arith.constant 0 : i32
    return %c0_i32, %c0_i32_0 : i32, i32
  }
  func.func @transform_5(%arg0: i32) -> (i32, i32) {
    %c0_i32 = arith.constant 0 : i32
    %c0_i32_0 = arith.constant 0 : i32
    return %arg0, %c0_i32 : i32, i32
  }
}

</mosaic_0001>

<bundles_post_ra>
// kernel: split.3
= control target key start
LH: loop header
LB: loop body
LE: loop exit
PB: predicated region body
PF: predicated region fallthrough
CT: control target
= control target key end

     0   :  { %v3_v0 = vlaneseq  ;;  %s28_s0 = inlined_call_operand.vmem [shape: f32[8,128], index: 0, kind: input, shape index: {}]   ;;  %s29_s1 = inlined_call_operand.vmem [shape: f32[8,3], index: 1, kind: output, shape index: {}]  }
   0x1   :  { %v2_v1 = vld [vmem:[%s28_s0] sm:$0xff]  ;;  %s11_s0 = smov 127  }
   0x2   :  { %v4_v2 = vand.u32 127, %v3_v0 }
   0x4   :  { %vm5_vm0 = vcmp.lt.s32.totalorder %v4_v2, 1 }
   0x5   :  { %v6_v3 = vsel %vm5_vm0, 0, %v2_v1 }
   0x6   :  { %7 = vrot.lane.b32.xlu0 %v6_v3, %s11_s0 }
  0x78   :  { %v8_v4 = vpop.permute.xlu0 %7 }
  0x79   :  { %9 = vst [vmem:[%s29_s1] sm:$0xff] %v8_v4 }

// kernel: multi_head_classifier.1
= control target key start
LH: loop header
LB: loop body
LE: loop exit
PB: predicated region body
PF: predicated region fallthrough
CT: control target
= control target key end

     0   :  { %vm29_vm0 = vcmask 261120   ;;  %s204_s1 = inlined_call_operand.vmem [shape: f32[32,128], index: 1, kind: input, shape index: {}]   ;;  %s205_s3 = inlined_call_operand.vmem [shape: f32[128,128], index: 3, kind: input, shape index: {}]   ;;  %s206_s0 = inlined_call_operand.vmem [shape: f32[8,32], index: 0, kind: input, shape index: {}]   ;;  %s207_s2 = inlined_call_operand.vmem [shape: f32[1,128], index: 2, kind: input, shape index: {}]   ;;  %s208_s4 = inlined_call_operand.vmem [shape: f32[1,128], index: 4, kind: input, shape index: {}]   ;;  %s209_s5 = inlined_call_operand.vmem [shape: f32[8,128], index: 5, kind: output, shape index: {}]  }
   0x1   :  { %v24_v0 = vld [vmem:[%s204_s1 + $0x18] sm:$0xff]  ;;  %v23_v1 = vld [vmem:[%s204_s1 + $0x10] sm:$0xff]  ;;  %v22_v3 = vld [vmem:[%s204_s1 + $0x8] sm:$0xff] }
   0x2   :  { %45 = vmatpush.msra.mxu0 %v24_v0  ;;  %v69_v2 = vld [vmem:[%s205_s3 + $0x78] sm:$0xff]  ;;  %v68_v4 = vld [vmem:[%s205_s3 + $0x70] sm:$0xff]  ;;  %v67_v5 = vld [vmem:[%s205_s3 + $0x68] sm:$0xff] }
   0x3   :  { %74 = vmatpush.msra.mxu1 %v69_v2  ;;  %v21_v6 = vld [vmem:[%s204_s1] sm:$0xff]  ;;  %v65_v9 = vld [vmem:[%s205_s3 + $0x58] sm:$0xff]  ;;  %v64_v10 = vld [vmem:[%s205_s3 + $0x50] sm:$0xff] }
   0x4   :  { %46 = vmatpush.msra.mxu0 %v23_v1  ;;  %v20_v7 = vld [vmem:[%s206_s0] sm:$0xff]  ;;  %v63_v11 = vld [vmem:[%s205_s3 + $0x48] sm:$0xff]  ;;  %v61_v13 = vld [vmem:[%s205_s3 + $0x38] sm:$0xff] }
   0x5   :  { %75 = vmatpush.msra.mxu1 %v68_v4  ;;  %v66_v8 = vld [vmem:[%s205_s3 + $0x60] sm:$0xff]  ;;  %v60_v14 = vld [vmem:[%s205_s3 + $0x30] sm:$0xff]  ;;  %v59_v15 = vld [vmem:[%s205_s3 + $0x28] sm:$0xff] }
   0x6   :  { %47 = vmatpush.msra.mxu0 %v22_v3  ;;  %v62_v12 = vld [vmem:[%s205_s3 + $0x40] sm:$0xff]  ;;  %v57_v17 = vld [vmem:[%s205_s3 + $0x18] sm:$0xff]  ;;  %v56_v18 = vld [vmem:[%s205_s3 + $0x10] sm:$0xff] }
   0x7   :  { %76 = vmatpush.msra.mxu1 %v67_v5  ;;  %v58_v16 = vld [vmem:[%s205_s3 + $0x20] sm:$0xff]  ;;  %v55_v19 = vld [vmem:[%s205_s3 + $0x8] sm:$0xff] }
   0x8   :  { %48 = vmatpush.msra.mxu0 %v21_v6  ;;  %v54_v20 = vld [vmem:[%s205_s3] sm:$0xff] }
   0x9   :  { %99 = vmatmul.msk.f32.vlgmr.msra.gmra.mxu0 %vm29_vm0, %v20_v7  ;;  %77 = vmatpush.msra.mxu1 %v66_v8  ;;  %v100_v21 = vld [vmem:[%s207_s2] ss:$0 sm:$0xff] }
   0xa   :  { %v101_v25 = vld [vmem:[%s208_s4] ss:$0 sm:$0xff] }
   0xb   :  { %78 = vmatpush.msra.mxu1 %v65_v9 }
   0xd   :  { %79 = vmatpush.msra.mxu1 %v64_v10 }
   0xf   :  { %80 = vmatpush.msra.mxu1 %v63_v11 }
  0x11   :  { %81 = vmatpush.msra.mxu1 %v62_v12 }
  0x13   :  { %82 = vmatpush.msra.mxu1 %v61_v13 }
  0x15   :  { %83 = vmatpush.msra.mxu1 %v60_v14 }
  0x17   :  { %84 = vmatpush.msra.mxu1 %v59_v15 }
  0x19   :  { %85 = vmatpush.msra.mxu1 %v58_v16 }
  0x1b   :  { %86 = vmatpush.msra.mxu1 %v57_v17 }
  0x1d   :  { %87 = vmatpush.msra.mxu1 %v56_v18 }
  0x1f   :  { %88 = vmatpush.msra.mxu1 %v55_v19 }
  0x21   :  { %89 = vmatpush.msra.mxu1 %v54_v20 }
  0x86   :  { %v50_v22 = vpop.f32.mrf.mxu0 }
  0x87   :  { %v51_v23 = vadd.f32 %v100_v21, %v50_v22 }
  0x89   :  { %v53_v24 = vmax.f32 %v51_v23, 0.0 }
  0x8b   :  { %90 = vmatmul.f32.vlgmr.msra.gmra.mxu1 %v53_v24 }
 0x108   :  { %v91_v26 = vpop.f32.mrf.mxu1 }
 0x109   :  { %v92_v27 = vadd.f32 %v101_v25, %v91_v26 }
 0x10b   :  { %94 = vst [vmem:[%s209_s5] sm:$0xff] %v92_v27 }

</bundles_post_ra>
